<compile_context>
chip_gen: v7x
topology: tpu7x:2x2x1
jax: 0.10.0
libtpu: 0.0.40
codegen_flags: <defaults>
</compile_context>

<pallas_src>
import functools
import math

import jax
import jax.numpy as jnp
from jax.experimental import pallas as pl
from jax.experimental.pallas import tpu as pltpu


def _weight_norm(g, v):
    # PyTorch weight_norm(dim=0): w = g * v / ||v|| with the norm taken over
    # all dims except the output-channel dim.
    v = v.astype(jnp.float32)
    norm = jnp.sqrt(jnp.sum(v * v, axis=(1, 2), keepdims=True))
    return g.astype(jnp.float32) * v / norm


# --------------------------- kernel body ----------------------------------- #
def _temporal_block_body(tloc_ref, x_ref, w1_ref, b1_ref, w2_ref, b2_ref,
                         wd_ref, bd_ref, y_ref, h_ref, *, K, dilation, pad):
    """One lane-dense batch block per grid step.

    tloc_ref : (1, BL)            int32, lane t -> t % L (time within segment)
    x_ref    : (1, C_in, pad+BL)  `pad` zero lanes, then b_blk segments of L
    w1_ref   : (K, C_out, C_in)   tap-major conv1 weight
    b1_ref   : (C_out, 1)
    w2_ref   : (K, C_out, C_out)  tap-major conv2 weight
    b2_ref   : (C_out, 1)
    wd_ref   : (C_out, C_in)      1x1 downsample weight (None => identity)
    bd_ref   : (C_out, 1)         (None => identity)
    y_ref    : (1, C_out, BL)
    h_ref    : (C_out, pad+BL)    VMEM scratch for the conv1 activation
    """
    c_in = x_ref.shape[1]
    c_out = y_ref.shape[1]
    BL = y_ref.shape[2]
    cdt = w1_ref.dtype
    shifts = tuple((K - 1 - k) * dilation for k in range(K))

    # Hoisted causal-mask operands (JAX does not CSE broadcast_in_dim).
    tl = tloc_ref[...]                                  # (1, BL) int32
    tl_in = jnp.broadcast_to(tl, (c_in, BL))
    tl_h = jnp.broadcast_to(tl, (c_out, BL))

    # ---- conv1: dilated causal conv as K MXU matmuls on offset lane-slices.
    # Tap k reads lanes [k*d, k*d+BL) of the front-padded block, i.e. the input
    # shifted right by s_k = (K-1-k)*d.  Lanes with (t % L) < s_k would bleed
    # in from the previous batch segment, so they are masked to zero.
    acc1 = jnp.zeros((c_out, BL), jnp.float32)
    for k, s in enumerate(shifts):
        xk = x_ref[0, :, k * dilation: k * dilation + BL]        # (C_in, BL)
        if s > 0:
            xk = jnp.where(tl_in >= s, xk, jnp.zeros_like(xk))
        acc1 += jnp.dot(w1_ref[k], xk, preferred_element_type=jnp.float32)
    h1 = jnp.maximum(acc1 + b1_ref[...], 0.0)
    # TODO(synk): dropout1/dropout2 omitted (identity in the inference forward).

    # ---- conv2: stage h1 once into a left-padded lane-dense scratch (single
    # dense store), then reuse the same offset-slice + mask trick.
    if pad > 0:
        h_ref[:, :pad] = jnp.zeros((c_out, pad), cdt)
    h_ref[:, pad:] = h1.astype(cdt)

    acc2 = jnp.zeros((c_out, BL), jnp.float32)
    for k, s in enumerate(shifts):
        hk = h_ref[:, k * dilation: k * dilation + BL]           # (C_out, BL)
        if s > 0:
            hk = jnp.where(tl_h >= s, hk, jnp.zeros_like(hk))
        acc2 += jnp.dot(w2_ref[k], hk, preferred_element_type=jnp.float32)
    h2 = jnp.maximum(acc2 + b2_ref[...], 0.0)

    # ---- residual: 1x1 conv when C_in != C_out, otherwise a plain identity
    # (specialized variant: no identity-matrix matmul, no wd/bd DMAs).
    x_res = x_ref[0, :, pad:]                                    # (C_in, BL)
    if wd_ref is None:
        res = x_res.astype(jnp.float32)
    else:
        res = jnp.dot(wd_ref[...], x_res,
                      preferred_element_type=jnp.float32) + bd_ref[...]

    y_ref[0] = jnp.maximum(h2 + res, 0.0).astype(y_ref.dtype)


def _make_kernel(*, K, dilation, pad, has_down):
    body = functools.partial(_temporal_block_body,
                             K=K, dilation=dilation, pad=pad)
    if has_down:
        def kernel(tloc, x, w1, b1, w2, b2, wd, bd, y, h):
            body(tloc, x, w1, b1, w2, b2, wd, bd, y, h)
    else:
        def kernel(tloc, x, w1, b1, w2, b2, y, h):
            body(tloc, x, w1, b1, w2, b2, None, None, y, h)
    return kernel


# ----------------------------- wrapper ------------------------------------- #
def _choose_batch_block(B, L):
    """How many batch rows to fold into the lane axis per grid step."""
    max_lanes = 4096  # keep blocks small enough that double-buffering fits the
                      # default scoped-VMEM budget comfortably (incl. v7x)
    if B * L <= max_lanes:
        # Whole batch in one step; pad tiny batches up to >=128 output lanes so
        # the store is a full, unmasked vreg-wide vst.
        b_blk = B if B * L >= 128 else -(-128 // L)
        return b_blk, 1
    b_blk = 128 // math.gcd(L, 128)       # smallest b with (b*L) % 128 == 0
    while b_blk * 2 * L <= max_lanes and b_blk * 2 < B:
        b_blk *= 2
    return b_blk, -(-B // b_blk)


def temporal_block_forward(x, params, *, kernel_size, dilation,
                           compute_dtype=jnp.float32):
    """x: (B, C_in, L) f32 -> (B, C_out, L) f32 (inference forward)."""
    B, C_in, L = x.shape
    K = kernel_size
    pad = (K - 1) * dilation

    w1 = _weight_norm(params["g1"], params["v1"])            # (C_out, C_in, K)
    w2 = _weight_norm(params["g2"], params["v2"])            # (C_out, C_out, K)
    C_out = w1.shape[0]
    w1_t = jnp.transpose(w1, (2, 0, 1)).astype(compute_dtype)  # (K, C_out, C_in)
    w2_t = jnp.transpose(w2, (2, 0, 1)).astype(compute_dtype)  # (K, C_out, C_out)
    b1 = params["b1"].reshape(C_out, 1).astype(jnp.float32)
    b2 = params["b2"].reshape(C_out, 1).astype(jnp.float32)
    has_down = params.get("w_down") is not None

    # Lane-dense layout: fold b_blk batch rows into the lane axis.
    b_blk, n_blk = _choose_batch_block(B, L)
    B_pad = b_blk * n_blk
    BL = b_blk * L

    xb = x.astype(compute_dtype)
    if B_pad != B:
        xb = jnp.pad(xb, ((0, B_pad - B), (0, 0), (0, 0)))
    xb = (xb.reshape(n_blk, b_blk, C_in, L)
            .transpose(0, 2, 1, 3)
            .reshape(n_blk, C_in, BL))
    if pad > 0:
        # Causal left margin per *block* (segment starts inside the block are
        # handled by the in-kernel lane mask).
        xb = jnp.pad(xb, ((0, 0), (0, 0), (pad, 0)))
    # lane -> time-within-segment index used by the causal masks.
    tloc = (jnp.arange(BL, dtype=jnp.int32) % L).reshape(1, BL)

    kernel = _make_kernel(K=K, dilation=dilation, pad=pad, has_down=has_down)

    in_specs = [
        pl.BlockSpec((1, BL), lambda i: (0, 0)),                  # tloc
        pl.BlockSpec((1, C_in, pad + BL), lambda i: (i, 0, 0)),   # x (streamed)
        pl.BlockSpec((K, C_out, C_in), lambda i: (0, 0, 0)),      # w1 (resident)
        pl.BlockSpec((C_out, 1), lambda i: (0, 0)),               # b1
        pl.BlockSpec((K, C_out, C_out), lambda i: (0, 0, 0)),     # w2
        pl.BlockSpec((C_out, 1), lambda i: (0, 0)),               # b2
    ]
    args = [tloc, xb, w1_t, b1, w2_t, b2]
    if has_down:
        wd = params["w_down"].reshape(C_out, C_in).astype(compute_dtype)
        bd = params["b_down"].reshape(C_out, 1).astype(jnp.float32)
        in_specs += [pl.BlockSpec((C_out, C_in), lambda i: (0, 0)),
                     pl.BlockSpec((C_out, 1), lambda i: (0, 0))]
        args += [wd, bd]

    y = pl.pallas_call(
        kernel,
        out_shape=jax.ShapeDtypeStruct((n_blk, C_out, BL), jnp.float32),
        grid_spec=pltpu.PrefetchScalarGridSpec(
            num_scalar_prefetch=0,
            grid=(n_blk,),
            in_specs=in_specs,
            out_specs=pl.BlockSpec((1, C_out, BL), lambda i: (i, 0, 0)),
            scratch_shapes=[pltpu.VMEM((C_out, pad + BL), compute_dtype)],
        ),
        compiler_params=pltpu.CompilerParams(
            dimension_semantics=("parallel",)),
    )(*args)

    # (n_blk, C_out, b_blk*L) -> (B, C_out, L)
    y = (y.reshape(n_blk, C_out, b_blk, L)
          .transpose(0, 2, 1, 3)
          .reshape(B_pad, C_out, L))
    return y[:B]


# ----------------------- pure-JAX reference -------------------------------- #
def _ref_causal_conv(x, w, b, dilation):
    B, C_in, L = x.shape
    C_out, _, K = w.shape
    pad = (K - 1) * dilation
    xp = jnp.pad(x, ((0, 0), (0, 0), (pad, 0)))
    out = jnp.zeros((B, C_out, L), jnp.float32)
    for k in range(K):
        out = out + jnp.einsum("oc,bcl->bol", w[:, :, k],
                               xp[:, :, k * dilation: k * dilation + L])
    return out + b[None, :, None]


def temporal_block_reference(x, params, *, kernel_size, dilation):
    w1 = _weight_norm(params["g1"], params["v1"])
    w2 = _weight_norm(params["g2"], params["v2"])
    h1 = jax.nn.relu(_ref_causal_conv(x, w1, params["b1"], dilation))
    h2 = jax.nn.relu(_ref_causal_conv(h1, w2, params["b2"], dilation))
    if params.get("w_down") is not None:
        res = (jnp.einsum("oc,bcl->bol", params["w_down"][:, :, 0], x)
               + params["b_down"][None, :, None])
    else:
        res = x
    return jax.nn.relu(h2 + res)


def init_params(key, n_inputs, n_outputs, kernel_size):
    ks = jax.random.split(key, 8)
    params = {
        "v1": 0.01 * jax.random.normal(ks[0], (n_outputs, n_inputs, kernel_size), jnp.float32),
        "g1": jax.random.uniform(ks[1], (n_outputs, 1, 1), jnp.float32, 0.5, 1.5),
        "b1": 0.1 * jax.random.normal(ks[2], (n_outputs,), jnp.float32),
        "v2": 0.01 * jax.random.normal(ks[3], (n_outputs, n_outputs, kernel_size), jnp.float32),
        "g2": jax.random.uniform(ks[4], (n_outputs, 1, 1), jnp.float32, 0.5, 1.5),
        "b2": 0.1 * jax.random.normal(ks[5], (n_outputs,), jnp.float32),
    }
    if n_inputs != n_outputs:
        params["w_down"] = 0.01 * jax.random.normal(
            ks[6], (n_outputs, n_inputs, 1), jnp.float32)
        params["b_down"] = 0.1 * jax.random.normal(ks[7], (n_outputs,), jnp.float32)
    else:
        params["w_down"] = None
        params["b_down"] = None
    return params


if __name__ == "__main__":
    root = jax.random.PRNGKey(0)

    def run_case(seed, B, C_in, C_out, K, dil, L,
                 dtype=jnp.float32, tol=1e-5):
        kp, kx = jax.random.split(jax.random.fold_in(root, seed))
        params = init_params(kp, C_in, C_out, K)
        x = jax.random.normal(kx, (B, C_in, L), jnp.float32)
        y = temporal_block_forward(x, params, kernel_size=K, dilation=dil,
                                   compute_dtype=dtype)
        jax.block_until_ready(y)
        y_ref = temporal_block_reference(x, params, kernel_size=K, dilation=dil)
        assert y.shape == (B, C_out, L)
        err = float(jnp.max(jnp.abs(y - y_ref)))
        assert jnp.allclose(y, y_ref, atol=tol, rtol=tol), (
            f"case seed={seed}: max abs err {err}")

    # 1) Downsample path (C_in != C_out): TemporalBlock(4, 8, k=3, d=2, pad=4).
    run_case(0, B=2, C_in=4, C_out=8, K=3, dil=2, L=16)
    # 2) Identity-residual path (specialized kernel variant, no 1x1 conv).
    run_case(1, B=2, C_in=8, C_out=8, K=3, dil=1, L=16)
    # 3) Multi-block grid path (several lane-dense batch blocks per call).
    run_case(2, B=8, C_in=16, C_out=32, K=3, dil=4, L=768)
    # 4) bf16 inputs/weights with f32 accumulation (bandwidth optimization).
    run_case(3, B=2, C_in=4, C_out=8, K=3, dil=2, L=16,
             dtype=jnp.bfloat16, tol=1e-1)

    print("KERNEL_OK")
</pallas_src>

<mosaic_0001>
module attributes {stable_mosaic.version = 11 : i64} {
  func.func @kernel(%arg0: i32, %arg1: memref<1x128xi32, #tpu.memory_space<vmem>>, %arg2: memref<1x4x132xf32, #tpu.memory_space<vmem>>, %arg3: memref<3x8x4xf32, #tpu.memory_space<vmem>>, %arg4: memref<8x1xf32, #tpu.memory_space<vmem>>, %arg5: memref<3x8x8xf32, #tpu.memory_space<vmem>>, %arg6: memref<8x1xf32, #tpu.memory_space<vmem>>, %arg7: memref<8x4xf32, #tpu.memory_space<vmem>>, %arg8: memref<8x1xf32, #tpu.memory_space<vmem>>, %arg9: memref<1x8x128xf32, #tpu.memory_space<vmem>>, %arg10: memref<8x132xf32, #tpu.memory_space<vmem>>) attributes {dimension_semantics = [#tpu.dimension_semantics<parallel>], iteration_bounds = array<i64: 1>, scalar_prefetch = 0 : i64, scratch_operands = 1 : i64, tpu.core_type = #tpu.core_type<tc>, window_params = [{pipeline_mode = #tpu.pipeline_mode<synchronous>, transform_indices = @transform_0, window_bounds = array<i64: 1, 128>}, {transform_indices = @transform_1, window_bounds = array<i64: 1, 4, 132>}, {pipeline_mode = #tpu.pipeline_mode<synchronous>, transform_indices = @transform_2, window_bounds = array<i64: 3, 8, 4>}, {pipeline_mode = #tpu.pipeline_mode<synchronous>, transform_indices = @transform_3, window_bounds = array<i64: 8, 1>}, {pipeline_mode = #tpu.pipeline_mode<synchronous>, transform_indices = @transform_4, window_bounds = array<i64: 3, 8, 8>}, {pipeline_mode = #tpu.pipeline_mode<synchronous>, transform_indices = @transform_5, window_bounds = array<i64: 8, 1>}, {pipeline_mode = #tpu.pipeline_mode<synchronous>, transform_indices = @transform_6, window_bounds = array<i64: 8, 4>}, {pipeline_mode = #tpu.pipeline_mode<synchronous>, transform_indices = @transform_7, window_bounds = array<i64: 8, 1>}, {transform_indices = @transform_8, window_bounds = array<i64: 1, 8, 128>}]} {
    %c0 = arith.constant 0 : index
    %c0_0 = arith.constant 0 : index
    %0 = vector.load %arg1[%c0, %c0_0] : memref<1x128xi32, #tpu.memory_space<vmem>>, vector<1x128xi32>
    %1 = vector.shape_cast %0 : vector<1x128xi32> to vector<1x128xi32>
    %2 = vector.broadcast %1 : vector<1x128xi32> to vector<4x128xi32>
    %3 = vector.shape_cast %0 : vector<1x128xi32> to vector<1x128xi32>
    %4 = vector.broadcast %3 : vector<1x128xi32> to vector<8x128xi32>
    %cst = arith.constant 0.000000e+00 : f32
    %5 = vector.broadcast %cst : f32 to vector<8x128xf32>
    %c0_1 = arith.constant 0 : index
    %c0_2 = arith.constant 0 : index
    %c0_3 = arith.constant 0 : index
    %6 = vector.load %arg2[%c0_1, %c0_2, %c0_3] : memref<1x4x132xf32, #tpu.memory_space<vmem>>, vector<1x4x128xf32>
    %7 = vector.shape_cast %6 : vector<1x4x128xf32> to vector<4x128xf32>
    %c4_i32 = arith.constant 4 : i32
    %8 = vector.broadcast %c4_i32 : i32 to vector<4x128xi32>
    %9 = arith.cmpi sge, %2, %8 : vector<4x128xi32>
    %cst_4 = arith.constant 0.000000e+00 : f32
    %10 = vector.broadcast %cst_4 : f32 to vector<4x128xf32>
    %11 = arith.select %9, %7, %10 : vector<4x128xi1>, vector<4x128xf32>
    %c0_5 = arith.constant 0 : index
    %c0_6 = arith.constant 0 : index
    %c0_7 = arith.constant 0 : index
    %12 = vector.load %arg3[%c0_5, %c0_6, %c0_7] : memref<3x8x4xf32, #tpu.memory_space<vmem>>, vector<1x8x4xf32>
    %13 = vector.shape_cast %12 : vector<1x8x4xf32> to vector<8x4xf32>
    %cst_8 = arith.constant dense<0.000000e+00> : vector<8x128xf32>
    %14 = tpu.matmul %13, %11, %cst_8 {dimension_numbers = #tpu.dot_dimension_numbers<[1], [0], [0], [1], [0, 0, 1, 1], [], []>} : vector<8x4xf32>, vector<4x128xf32>, vector<8x128xf32> -> vector<8x128xf32>
    %15 = arith.addf %5, %14 : vector<8x128xf32>
    %c0_9 = arith.constant 0 : index
    %c0_10 = arith.constant 0 : index
    %c2 = arith.constant 2 : index
    %16 = vector.load %arg2[%c0_9, %c0_10, %c2] : memref<1x4x132xf32, #tpu.memory_space<vmem>>, vector<1x4x128xf32>
    %17 = vector.shape_cast %16 : vector<1x4x128xf32> to vector<4x128xf32>
    %c2_i32 = arith.constant 2 : i32
    %18 = vector.broadcast %c2_i32 : i32 to vector<4x128xi32>
    %19 = arith.cmpi sge, %2, %18 : vector<4x128xi32>
    %cst_11 = arith.constant 0.000000e+00 : f32
    %20 = vector.broadcast %cst_11 : f32 to vector<4x128xf32>
    %21 = arith.select %19, %17, %20 : vector<4x128xi1>, vector<4x128xf32>
    %c1 = arith.constant 1 : index
    %c0_12 = arith.constant 0 : index
    %c0_13 = arith.constant 0 : index
    %22 = vector.load %arg3[%c1, %c0_12, %c0_13] : memref<3x8x4xf32, #tpu.memory_space<vmem>>, vector<1x8x4xf32>
    %23 = vector.shape_cast %22 : vector<1x8x4xf32> to vector<8x4xf32>
    %cst_14 = arith.constant dense<0.000000e+00> : vector<8x128xf32>
    %24 = tpu.matmul %23, %21, %cst_14 {dimension_numbers = #tpu.dot_dimension_numbers<[1], [0], [0], [1], [0, 0, 1, 1], [], []>} : vector<8x4xf32>, vector<4x128xf32>, vector<8x128xf32> -> vector<8x128xf32>
    %25 = arith.addf %15, %24 : vector<8x128xf32>
    %c0_15 = arith.constant 0 : index
    %c0_16 = arith.constant 0 : index
    %c4 = arith.constant 4 : index
    %26 = vector.load %arg2[%c0_15, %c0_16, %c4] : memref<1x4x132xf32, #tpu.memory_space<vmem>>, vector<1x4x128xf32>
    %27 = vector.shape_cast %26 : vector<1x4x128xf32> to vector<4x128xf32>
    %c2_17 = arith.constant 2 : index
    %c0_18 = arith.constant 0 : index
    %c0_19 = arith.constant 0 : index
    %28 = vector.load %arg3[%c2_17, %c0_18, %c0_19] : memref<3x8x4xf32, #tpu.memory_space<vmem>>, vector<1x8x4xf32>
    %29 = vector.shape_cast %28 : vector<1x8x4xf32> to vector<8x4xf32>
    %cst_20 = arith.constant dense<0.000000e+00> : vector<8x128xf32>
    %30 = tpu.matmul %29, %27, %cst_20 {dimension_numbers = #tpu.dot_dimension_numbers<[1], [0], [0], [1], [0, 0, 1, 1], [], []>} : vector<8x4xf32>, vector<4x128xf32>, vector<8x128xf32> -> vector<8x128xf32>
    %31 = arith.addf %25, %30 : vector<8x128xf32>
    %c0_21 = arith.constant 0 : index
    %c0_22 = arith.constant 0 : index
    %32 = vector.load %arg4[%c0_21, %c0_22] : memref<8x1xf32, #tpu.memory_space<vmem>>, vector<8x1xf32>
    %33 = vector.broadcast %32 : vector<8x1xf32> to vector<8x128xf32>
    %34 = arith.addf %31, %33 : vector<8x128xf32>
    %cst_23 = arith.constant 0.000000e+00 : f32
    %35 = vector.broadcast %cst_23 : f32 to vector<8x128xf32>
    %36 = arith.maximumf %34, %35 : vector<8x128xf32>
    %cst_24 = arith.constant 0.000000e+00 : f32
    %37 = vector.broadcast %cst_24 : f32 to vector<8x4xf32>
    %c0_25 = arith.constant 0 : index
    %c0_26 = arith.constant 0 : index
    %38 = vector.load %arg10[%c0_25, %c0_26] : memref<8x132xf32, #tpu.memory_space<vmem>>, vector<8x4xf32>
    tpu.vector_store %arg10[%c0_25, %c0_26], %37 {strides = array<i32>} : memref<8x132xf32, #tpu.memory_space<vmem>>, vector<8x4xf32>,
    %c0_27 = arith.constant 0 : index
    %c4_28 = arith.constant 4 : index
    %39 = vector.load %arg10[%c0_27, %c4_28] : memref<8x132xf32, #tpu.memory_space<vmem>>, vector<8x128xf32>
    tpu.vector_store %arg10[%c0_27, %c4_28], %36 {strides = array<i32>} : memref<8x132xf32, #tpu.memory_space<vmem>>, vector<8x128xf32>,
    %cst_29 = arith.constant 0.000000e+00 : f32
    %40 = vector.broadcast %cst_29 : f32 to vector<8x128xf32>
    %c0_30 = arith.constant 0 : index
    %c0_31 = arith.constant 0 : index
    %41 = vector.load %arg10[%c0_30, %c0_31] : memref<8x132xf32, #tpu.memory_space<vmem>>, vector<8x128xf32>
    %c4_i32_32 = arith.constant 4 : i32
    %42 = vector.broadcast %c4_i32_32 : i32 to vector<8x128xi32>
    %43 = arith.cmpi sge, %4, %42 : vector<8x128xi32>
    %cst_33 = arith.constant 0.000000e+00 : f32
    %44 = vector.broadcast %cst_33 : f32 to vector<8x128xf32>
    %45 = arith.select %43, %41, %44 : vector<8x128xi1>, vector<8x128xf32>
    %c0_34 = arith.constant 0 : index
    %c0_35 = arith.constant 0 : index
    %c0_36 = arith.constant 0 : index
    %46 = vector.load %arg5[%c0_34, %c0_35, %c0_36] : memref<3x8x8xf32, #tpu.memory_space<vmem>>, vector<1x8x8xf32>
    %47 = vector.shape_cast %46 : vector<1x8x8xf32> to vector<8x8xf32>
    %cst_37 = arith.constant dense<0.000000e+00> : vector<8x128xf32>
    %48 = tpu.matmul %47, %45, %cst_37 {dimension_numbers = #tpu.dot_dimension_numbers<[1], [0], [0], [1], [0, 0, 1, 1], [], []>} : vector<8x8xf32>, vector<8x128xf32>, vector<8x128xf32> -> vector<8x128xf32>
    %49 = arith.addf %40, %48 : vector<8x128xf32>
    %c0_38 = arith.constant 0 : index
    %c2_39 = arith.constant 2 : index
    %50 = vector.load %arg10[%c0_38, %c2_39] : memref<8x132xf32, #tpu.memory_space<vmem>>, vector<8x128xf32>
    %c2_i32_40 = arith.constant 2 : i32
    %51 = vector.broadcast %c2_i32_40 : i32 to vector<8x128xi32>
    %52 = arith.cmpi sge, %4, %51 : vector<8x128xi32>
    %cst_41 = arith.constant 0.000000e+00 : f32
    %53 = vector.broadcast %cst_41 : f32 to vector<8x128xf32>
    %54 = arith.select %52, %50, %53 : vector<8x128xi1>, vector<8x128xf32>
    %c1_42 = arith.constant 1 : index
    %c0_43 = arith.constant 0 : index
    %c0_44 = arith.constant 0 : index
    %55 = vector.load %arg5[%c1_42, %c0_43, %c0_44] : memref<3x8x8xf32, #tpu.memory_space<vmem>>, vector<1x8x8xf32>
    %56 = vector.shape_cast %55 : vector<1x8x8xf32> to vector<8x8xf32>
    %cst_45 = arith.constant dense<0.000000e+00> : vector<8x128xf32>
    %57 = tpu.matmul %56, %54, %cst_45 {dimension_numbers = #tpu.dot_dimension_numbers<[1], [0], [0], [1], [0, 0, 1, 1], [], []>} : vector<8x8xf32>, vector<8x128xf32>, vector<8x128xf32> -> vector<8x128xf32>
    %58 = arith.addf %49, %57 : vector<8x128xf32>
    %c0_46 = arith.constant 0 : index
    %c4_47 = arith.constant 4 : index
    %59 = vector.load %arg10[%c0_46, %c4_47] : memref<8x132xf32, #tpu.memory_space<vmem>>, vector<8x128xf32>
    %c2_48 = arith.constant 2 : index
    %c0_49 = arith.constant 0 : index
    %c0_50 = arith.constant 0 : index
    %60 = vector.load %arg5[%c2_48, %c0_49, %c0_50] : memref<3x8x8xf32, #tpu.memory_space<vmem>>, vector<1x8x8xf32>
    %61 = vector.shape_cast %60 : vector<1x8x8xf32> to vector<8x8xf32>
    %cst_51 = arith.constant dense<0.000000e+00> : vector<8x128xf32>
    %62 = tpu.matmul %61, %59, %cst_51 {dimension_numbers = #tpu.dot_dimension_numbers<[1], [0], [0], [1], [0, 0, 1, 1], [], []>} : vector<8x8xf32>, vector<8x128xf32>, vector<8x128xf32> -> vector<8x128xf32>
    %63 = arith.addf %58, %62 : vector<8x128xf32>
    %c0_52 = arith.constant 0 : index
    %c0_53 = arith.constant 0 : index
    %64 = vector.load %arg6[%c0_52, %c0_53] : memref<8x1xf32, #tpu.memory_space<vmem>>, vector<8x1xf32>
    %65 = vector.broadcast %64 : vector<8x1xf32> to vector<8x128xf32>
    %66 = arith.addf %63, %65 : vector<8x128xf32>
    %cst_54 = arith.constant 0.000000e+00 : f32
    %67 = vector.broadcast %cst_54 : f32 to vector<8x128xf32>
    %68 = arith.maximumf %66, %67 : vector<8x128xf32>
    %c0_55 = arith.constant 0 : index
    %c0_56 = arith.constant 0 : index
    %c4_57 = arith.constant 4 : index
    %69 = vector.load %arg2[%c0_55, %c0_56, %c4_57] : memref<1x4x132xf32, #tpu.memory_space<vmem>>, vector<1x4x128xf32>
    %70 = vector.shape_cast %69 : vector<1x4x128xf32> to vector<4x128xf32>
    %c0_58 = arith.constant 0 : index
    %c0_59 = arith.constant 0 : index
    %71 = vector.load %arg7[%c0_58, %c0_59] : memref<8x4xf32, #tpu.memory_space<vmem>>, vector<8x4xf32>
    %cst_60 = arith.constant dense<0.000000e+00> : vector<8x128xf32>
    %72 = tpu.matmul %71, %70, %cst_60 {dimension_numbers = #tpu.dot_dimension_numbers<[1], [0], [0], [1], [0, 0, 1, 1], [], []>} : vector<8x4xf32>, vector<4x128xf32>, vector<8x128xf32> -> vector<8x128xf32>
    %c0_61 = arith.constant 0 : index
    %c0_62 = arith.constant 0 : index
    %73 = vector.load %arg8[%c0_61, %c0_62] : memref<8x1xf32, #tpu.memory_space<vmem>>, vector<8x1xf32>
    %74 = vector.broadcast %73 : vector<8x1xf32> to vector<8x128xf32>
    %75 = arith.addf %72, %74 : vector<8x128xf32>
    %76 = arith.addf %68, %75 : vector<8x128xf32>
    %cst_63 = arith.constant 0.000000e+00 : f32
    %77 = vector.broadcast %cst_63 : f32 to vector<8x128xf32>
    %78 = arith.maximumf %76, %77 : vector<8x128xf32>
    %c0_64 = arith.constant 0 : index
    %c0_65 = arith.constant 0 : index
    %c0_66 = arith.constant 0 : index
    %79 = vector.load %arg9[%c0_64, %c0_65, %c0_66] : memref<1x8x128xf32, #tpu.memory_space<vmem>>, vector<1x8x128xf32>
    %80 = vector.shape_cast %79 : vector<1x8x128xf32> to vector<8x128xf32>
    %81 = vector.shape_cast %78 : vector<8x128xf32> to vector<1x8x128xf32>
    tpu.vector_store %arg9[%c0_64, %c0_65, %c0_66], %81 {strides = array<i32>} : memref<1x8x128xf32, #tpu.memory_space<vmem>>, vector<1x8x128xf32>,
    return
  }
  func.func @transform_0(%arg0: i32) -> (i32, i32) {
    %c0_i32 = arith.constant 0 : i32
    %c0_i32_0 = arith.constant 0 : i32
    %c0_i32_1 = arith.constant 0 : i32
    return %c0_i32, %c0_i32_0 : i32, i32
  }
  func.func @transform_1(%arg0: i32) -> (i32, i32, i32) {
    %c0_i32 = arith.constant 0 : i32
    %c0_i32_0 = arith.constant 0 : i32
    %c0_i32_1 = arith.constant 0 : i32
    return %arg0, %c0_i32, %c0_i32_0 : i32, i32, i32
  }
  func.func @transform_2(%arg0: i32) -> (i32, i32, i32) {
    %c0_i32 = arith.constant 0 : i32
    %c0_i32_0 = arith.constant 0 : i32
    %c0_i32_1 = arith.constant 0 : i32
    %c0_i32_2 = arith.constant 0 : i32
    return %c0_i32, %c0_i32_0, %c0_i32_1 : i32, i32, i32
  }
  func.func @transform_3(%arg0: i32) -> (i32, i32) {
    %c0_i32 = arith.constant 0 : i32
    %c0_i32_0 = arith.constant 0 : i32
    %c0_i32_1 = arith.constant 0 : i32
    return %c0_i32, %c0_i32_0 : i32, i32
  }
  func.func @transform_4(%arg0: i32) -> (i32, i32, i32) {
    %c0_i32 = arith.constant 0 : i32
    %c0_i32_0 = arith.constant 0 : i32
    %c0_i32_1 = arith.constant 0 : i32
    %c0_i32_2 = arith.constant 0 : i32
    return %c0_i32, %c0_i32_0, %c0_i32_1 : i32, i32, i32
  }
  func.func @transform_5(%arg0: i32) -> (i32, i32) {
    %c0_i32 = arith.constant 0 : i32
    %c0_i32_0 = arith.constant 0 : i32
    %c0_i32_1 = arith.constant 0 : i32
    return %c0_i32, %c0_i32_0 : i32, i32
  }
  func.func @transform_6(%arg0: i32) -> (i32, i32) {
    %c0_i32 = arith.constant 0 : i32
    %c0_i32_0 = arith.constant 0 : i32
    %c0_i32_1 = arith.constant 0 : i32
    return %c0_i32, %c0_i32_0 : i32, i32
  }
  func.func @transform_7(%arg0: i32) -> (i32, i32) {
    %c0_i32 = arith.constant 0 : i32
    %c0_i32_0 = arith.constant 0 : i32
    %c0_i32_1 = arith.constant 0 : i32
    return %c0_i32, %c0_i32_0 : i32, i32
  }
  func.func @transform_8(%arg0: i32) -> (i32, i32, i32) {
    %c0_i32 = arith.constant 0 : i32
    %c0_i32_0 = arith.constant 0 : i32
    %c0_i32_1 = arith.constant 0 : i32
    return %arg0, %c0_i32, %c0_i32_0 : i32, i32, i32
  }
}

</mosaic_0001>

<bundles_post_ra>
// kernel: tpu_custom_call.1
= control target key start
LH: loop header
LB: loop body
LE: loop exit
PB: predicated region body
PF: predicated region fallthrough
CT: control target
= control target key end

     0   :  { %s770_s29 = smov 126   ;;  %s771_s30 = smov 124   ;;  %vm57_vm0 = vcmask 1043456   ;;  %v772_v4 = vmov 0.0   ;;  %vm53_vm2 = vcmask 31744   ;;  %vm773_vm3 = vmmov 0   ;;  %s947_s0 = inlined_call_operand.vmem [shape: s32[1,128], index: 0, kind: input, shape index: {}]   ;;  %s948_s1 = inlined_call_operand.vmem [shape: f32[1,4,132], index: 1, kind: input, shape index: {}]   ;;  %s949_s2 = inlined_call_operand.vmem [shape: f32[3,8,4], index: 2, kind: input, shape index: {}]   ;;  %s950_s3 = inlined_call_operand.vmem [shape: f32[8,1], index: 3, kind: input, shape index: {}]   ;;  %s951_s4 = inlined_call_operand.vmem [shape: f32[3,8,8], index: 4, kind: input, shape index: {}]   ;;  %s952_s5 = inlined_call_operand.vmem [shape: f32[8,1], index: 5, kind: input, shape index: {}]   ;;  %s953_s6 = inlined_call_operand.vmem [shape: f32[8,4], index: 6, kind: input, shape index: {}]   ;;  %s954_s7 = inlined_call_operand.vmem [shape: f32[8,1], index: 7, kind: input, shape index: {}]   ;;  %s955_s8 = inlined_call_operand.hbm [shape: f32[1,8,128], index: 8, kind: output, shape index: {}]  }
   0x1   :  { %v825_v0 = vld [vmem:[%s948_s1] sm:$0xff]  ;;  %701 = vmatprep.subr.mxu0 %v772_v4  ;;  %706 = vmatprep.subr.mxu1 %v772_v4  ;;  %302 = vst.msk [vmem:[#allocation2] sm:$0xff] %vm53_vm2, %v772_v4 }
   0x2   :  { %43 = vrot.lane.b32.xlu0 %v825_v0, %s770_s29  ;;  %v831_v1 = vcombine.high %v825_v0, %v825_v0  ;;  %212 = vrot.lane.b32.xlu1 %v825_v0, %s771_s30  ;;  %v838_v2 = vld [vmem:[%s947_s0] ss:$0 sm:$0xff] }
   0x3   :  { %v35_v3 = vld [vmem:[%s948_s1] sm:$0xf]  ;;  %vm36_vm1 = vcmp.ge.s32.totalorder %v838_v2, 4  ;;  %703 = vmatprep.mubr.msk.f32.mxu0 %vm773_vm3, %v772_v4  ;;  %708 = vmatprep.mubr.msk.f32.mxu1 %vm773_vm3, %v772_v4 }
   0x4   :  { %v37_v5 = vsel %vm36_vm1, %v35_v3, 0.0  ;;  %v38_v6 = vld [vmem:[%s949_s2] sm:$0xff] }
   0x5   :  { %13 = vsyncpa [#allocation4], 0  ;;  %707 = vmatpush3.msk.msra.mxu1 %vm57_vm0, %v37_v5  ;;  %v774_v7 = vmov 0   ;;  %v294_v8 = vld [vmem:[%s950_s3] sm:$0xff]  ;;  %vm47_vm4 = vcmask 1031168   ;;  %vm40_vm5 = vcmp.ge.s32.totalorder %v838_v2, 2 }
   0x6   :  { %743 = vset.pattern.permute.xlu0 %v774_v7  ;;  %214 = vrot.lane.b32.xlu1 %v831_v1, %s771_s30  ;;  %vm216_vm6 = vcmask 1014784   ;;  %v670_v14 = vld [vmem:[%s949_s2 + $0x8] sm:$0xff]  ;;  %v675_v17 = vld [vmem:[%s949_s2 + $0x10] sm:$0xff]  ;;  %s775_s18 = smov 4   ;;  %vm307_vm7 = vcmask 1047584   ;;  %vm325_vm8 = vcmask 64512  }
   0x7   :  { %45 = vrot.lane.b32.xlu0 %v831_v1, %s770_s29  ;;  %709 = vmatmul.mubr.msk.f32.vlgmr.msra.gmra.mrb[0].mxu1 %vm53_vm2, %v38_v6  ;;  %v312_v32 = vld [vmem:[%s951_s4] sm:$0xff]  ;;  %v678_v37 = vld [vmem:[%s951_s4 + $0x8] sm:$0xff]  ;;  %v683_v41 = vld [vmem:[%s951_s4 + $0x10] sm:$0xff]  ;;  %s776_s4 = smov [#allocation3]  }
   0x8   :  { %716 = vmatprep.subr.mxu1 %v772_v4  ;;  %718 = vmatprep.mubr.msk.f32.mxu1 %vm773_vm3, %v772_v4  ;;  %v564_v33 = vld [vmem:[%s954_s7] sm:$0xff] }
   0x9   :  { %744 = vset.pattern.permute.xlu1 %v774_v7  ;;  %v554_v34 = vld [vmem:[%s952_s5] sm:$0xff] }
   0xa   :  { %v563_v45 = vld [vmem:[%s953_s6] sm:$0xff]  ;;  %s661_s6 = sshll.u32 %s776_s4, 4  ;;  %s662_s6 = int_to_ptr.vmem [resolvable:$true] %s661_s6 }
   0xb   :  { %297 = vperm.xlu0 %743, %v294_v8   ;;  %s746_s28 = scalar_lea.vmem %s662_s6, 128  ;;  %p751_p1 = scmp.lt.s32.totalorder %s662_s6, %s662_s6 }
   0xc   :  { %p747_p0 = scmp.ne.s32.totalorder %s662_s6, %s746_s28  ;;  %p752_p2 = scmp.lt.s32.totalorder %s746_s28, %s746_s28 }
   0xe   :  { %p753_p3 = por %p752_p2, %p751_p1 }
  0x10   :  { %p754_p4 = pnand %p753_p3, %p747_p0 }
  0x74   :  { %v44_v9 = vpop.permute.xlu0 %43  ;;  %v213_v10 = vpop.permute.xlu1 %212 }
  0x78   :  { %v215_v13 = vpop.permute.xlu1 %214 }
  0x79   :  { %v46_v11 = vpop.permute.xlu0 %45  ;;  %v217_v16 = vsel %vm216_vm6, %v213_v10, %v215_v13 }
  0x7a   :  { %v48_v12 = vsel %vm47_vm4, %v44_v9, %v46_v11 }
  0x7b   :  { %v50_v15 = vsel %vm40_vm5, %v48_v12, 0.0 }
  0x7c   :  { %702 = vmatpush3.msk.msra.mxu0 %vm57_vm0, %v50_v15 }
  0x7d   :  { %704 = vmatmul.mubr.msk.f32.vlgmr.msra.gmra.mrb[0].mxu0 %vm53_vm2, %v670_v14  ;;  %711 = vmatprep.subr.mxu0 %v772_v4 }
  0x7e   :  { %712 = vmatpush3.msk.msra.mxu0 %vm57_vm0, %v217_v16  ;;  %713 = vmatprep.mubr.msk.f32.mxu0 %vm773_vm3, %v772_v4 }
  0x7f   :  { %721 = vmatprep.subr.mxu0 %v772_v4 }
  0x81   :  { %714 = vmatmul.mubr.msk.f32.vlgmr.msra.gmra.mrb[2].mxu0 %vm53_vm2, %v675_v17 }
  0x82   :  { %723 = vmatprep.mubr.msk.f32.mxu0 %vm773_vm3, %v772_v4 }
  0x8a   :  { %v298_v24 = vpop.permute.xlu0 %297 }
  0xda   :  { %v203_v18 = vpop.f32.mrb[0].mxu1 }
  0xdb   :  { %v710_v19 = vpop.f32.mrb[1].mxu1 }
 0x150   :  { %v127_v20 = vpop.f32.mrb[0].mxu0 }
 0x151   :  { %v204_v21 = vadd.f32 %v203_v18, %v127_v20  ;;  %v705_v22 = vpop.f32.mrb[1].mxu0 }
 0x154   :  { %v289_v23 = vpop.f32.mrb[2].mxu0 }
 0x155   :  { %v293_v25 = vadd.f32 %v289_v23, %v204_v21  ;;  %v715_v26 = vpop.f32.mrb[3].mxu0 }
 0x157   :  { %v300_v27 = vadd.f32 %v298_v24, %v293_v25 }
 0x159   :  { %v301_v28 = vmax.f32 %v300_v27, 0.0 }
 0x15b   :  { %304 = vrot.lane.b32.xlu1 %v301_v28, %s775_s18 }
 0x1cd   :  { %v305_v29 = vpop.permute.xlu1 %304 }
 0x1ce   :  { %308 = vst.msk [vmem:[#allocation2] sm:$0xff] %vm307_vm7, %v305_v29 }
 0x1cf   :  { %309 = vst.msk [vmem:[#allocation2 + $0x8] sm:$0xff] %vm53_vm2, %v305_v29 }
 0x1d5   :  { %v310_v31 = vld [vmem:[#allocation2] sm:$0xff] }
 0x1d6   :  { %v313_v30 = vld [vmem:[#allocation2 + $0x8] sm:$0xff]  ;;  %316 = vrot.lane.b32.xlu1 %v310_v31, %s770_s29  ;;  %722 = vmatpush3.msk.msra.mxu0 %vm36_vm1, %v310_v31 }
 0x1d7   :  { %318 = vrot.lane.b32.xlu0 %v313_v30, %s770_s29  ;;  %724 = vmatmul.mubr.msk.f32.vlgmr.msra.gmra.mrb[4].mxu0 %vm325_vm8, %v312_v32 }
 0x1d8   :  { %731 = vmatprep.subr.mxu0 %v772_v4  ;;  %733 = vmatprep.mubr.msk.f32.mxu0 %vm773_vm3, %v772_v4 }
 0x1da   :  { %474 = vrot.lane.b32.xlu1 %v310_v31, %s771_s30 }
 0x1db   :  { %476 = vrot.lane.b32.xlu0 %v313_v30, %s771_s30 }
 0x1de   :  { %572 = vrot.lane.b32.xlu1 %v825_v0, %s771_s30 }
 0x1df   :  { %574 = vrot.lane.b32.xlu0 %v831_v1, %s771_s30 }
 0x1e2   :  { %557 = vperm.xlu1 %744, %v554_v34  }
 0x1e3   :  { %567 = vperm.xlu0 %743, %v564_v33  }
 0x248   :  { %v317_v36 = vpop.permute.xlu1 %316 }
 0x249   :  { %v319_v35 = vpop.permute.xlu0 %318 }
 0x24a   :  { %v320_v38 = vsel %vm47_vm4, %v317_v36, %v319_v35 }
 0x24b   :  { %717 = vmatpush3.msk.msra.mxu1 %vm40_vm5, %v320_v38 }
 0x24c   :  { %719 = vmatmul.mubr.msk.f32.vlgmr.msra.gmra.mrb[2].mxu1 %vm325_vm8, %v678_v37  ;;  %726 = vmatprep.subr.mxu1 %v772_v4  ;;  %v475_v40 = vpop.permute.xlu1 %474 }
 0x24d   :  { %v477_v39 = vpop.permute.xlu0 %476  ;;  %728 = vmatprep.mubr.msk.f32.mxu1 %vm773_vm3, %v772_v4 }
 0x24e   :  { %v478_v42 = vsel %vm216_vm6, %v475_v40, %v477_v39 }
 0x24f   :  { %727 = vmatpush3.msra.mxu1 %v478_v42 }
 0x250   :  { %729 = vmatmul.mubr.msk.f32.vlgmr.msra.gmra.mrb[4].mxu1 %vm325_vm8, %v683_v41  ;;  %v573_v44 = vpop.permute.xlu1 %572 }
 0x251   :  { %v575_v43 = vpop.permute.xlu0 %574 }
 0x252   :  { %v576_v46 = vsel %vm216_vm6, %v573_v44, %v575_v43 }
 0x253   :  { %732 = vmatpush3.msk.msra.mxu0 %vm57_vm0, %v576_v46 }
 0x254   :  { %734 = vmatmul.mubr.msk.f32.vlgmr.msra.gmra.mrb[6].mxu0 %vm53_vm2, %v563_v45 }
 0x261   :  { %v558_v53 = vpop.permute.xlu1 %557 }
 0x262   :  { %v568_v57 = vpop.permute.xlu0 %567 }
 0x2aa   :  { %v468_v47 = vpop.f32.mrb[4].mxu0 }
 0x2ab   :  { %v725_v48 = vpop.f32.mrb[5].mxu0 }
 0x31f   :  { %v395_v49 = vpop.f32.mrb[2].mxu1 }
 0x320   :  { %v469_v50 = vadd.f32 %v468_v47, %v395_v49  ;;  %v720_v51 = vpop.f32.mrb[3].mxu1 }
 0x323   :  { %v549_v52 = vpop.f32.mrb[4].mxu1 }
 0x324   :  { %v553_v54 = vadd.f32 %v549_v52, %v469_v50  ;;  %v730_v55 = vpop.f32.mrb[5].mxu1 }
 0x326   :  { %v560_v56 = vadd.f32 %v558_v53, %v553_v54 }
 0x327   :  { %v648_v58 = vpop.f32.mrb[6].mxu0 }
 0x328   :  { %v561_v59 = vmax.f32 %v560_v56, 0.0  ;;  %v649_v60 = vadd.f32 %v648_v58, %v568_v57  ;;  %v735_v61 = vpop.f32.mrb[7].mxu0 }
 0x32a   :  { %v652_v62 = vadd.f32 %v649_v60, %v561_v59 }
 0x32c   :  { %v653_v63 = vmax.f32 %v652_v62, 0.0 }
 0x32e   :  { %654 = vst [vmem:[#allocation3] sm:$0xff] %v653_v63 }
 0x32f   :  { %757 = shalt.err (!%p754_p4)
}
 0x330   :  { %s758_s9 = scalar_lea.hbm %s955_s8, 128 }
 0x331   :  { %p759_p5 = scmp.ne.s32.totalorder %s955_s8, %s758_s9  ;;  %p762_p6 = scmp.lt.u32.totalorder %s758_s9, %s955_s8 }
 0x333   :  { %p764_p7 = pnand %p762_p6, %p759_p5 }
 0x335   :  { %767 = shalt.err (!%p764_p7)
}
 0x336   :  { %664 = dma.vmem_to_hbm [thread:$0]  %s662_s6, 128, %s955_s8, [#allocation4]  }
 0x337   :  { %768 = dma.done.wait [#allocation4], 128  }
 0x338   :  { %769 = vsyncadd [#allocation4], 4294967168 }
 0x339   :  { %668 = vsyncpa [#allocation4], 1 }

</bundles_post_ra>
